<compile_context>
chip_gen: v5e
topology: v5e:2x2
jax: 0.10.0
libtpu: 0.0.40
codegen_flags: <defaults>
</compile_context>

<pallas_src>
import math

import jax
import jax.numpy as jnp
from jax import lax
from jax.experimental import pallas as pl
from jax.experimental.pallas import tpu as pltpu


# --------------------------------------------------------------------------- #
# Kernel
# --------------------------------------------------------------------------- #
def _make_arcmargin_kernel(s, m, easy_margin):
    cos_m = math.cos(m)
    sin_m = math.sin(m)
    th = math.cos(math.pi - m)
    mm = math.sin(math.pi - m) * m

    def kernel(x_ref, w_ref, invx_ref, invw_ref, label_ref, o_ref):
        tb, tc = o_ref.shape

        # Raw (unnormalized) logits on the MXU: NT contraction of the
        # pipelined tiles, f32 accumulation.  No scaled-weight temporary.
        raw = lax.dot_general(
            x_ref[...], w_ref[...],
            dimension_numbers=(((1,), (1,)), ((), ())),
            preferred_element_type=jnp.float32)                  # (tb, tc)

        # Fold the L2 normalization into the matmul output (broadcast scales,
        # all f32 so the math is safe on v5e's no-bf16 VPU as well).
        cosine = raw * invx_ref[...] * invw_ref[...]             # (tb, tc)

        # One-hot over the classes covered by this tile (iota-compare).
        col = (pl.program_id(1) * tc
               + lax.broadcasted_iota(jnp.int32, (tb, tc), 1))
        one_hot = col == label_ref[...]                          # (tb, tc)

        # Margin math only on the label column -> O(tb) transcendental work.
        cos_lab = jnp.sum(jnp.where(one_hot, cosine, 0.0),
                          axis=-1, keepdims=True)                # (tb, 1)
        sin_lab = jnp.sqrt(jnp.clip(1.0 - cos_lab * cos_lab, 0.0, 1.0))
        phi = cos_lab * cos_m - sin_lab * sin_m
        if easy_margin:
            phi = jnp.where(cos_lab > 0.0, phi, cos_lab)
        else:
            phi = jnp.where(cos_lab > th, phi, cos_lab - mm)

        o_ref[...] = (jnp.where(one_hot, phi, cosine) * s).astype(o_ref.dtype)

    return kernel


# --------------------------------------------------------------------------- #
# Tiling / VMEM budgeting
# --------------------------------------------------------------------------- #
def _round_up(v, mult):
    return (v + mult - 1) // mult * mult


def _vmem_capacity_bytes():
    try:
        return int(pltpu.get_tpu_info().vmem_capacity_bytes)
    except Exception:
        return 64 * 1024 * 1024          # conservative fallback (v7x per-TC)


def _pick_tiles(B, C, D, stream_bytes, tile_c=None, tile_b=None):
    """Generation-aware tile sizes + scoped-VMEM request."""
    cap = _vmem_capacity_bytes()
    # Request ~65% of physical VMEM (≈42 MiB on v7x's 64 MiB, ≈83 MiB on
    # v5e/v6e's 128 MiB); target the accounted working set at ~80% of that.
    vmem_limit = int(cap * 0.65)
    budget = int(vmem_limit * 0.80)

    if tile_b is None:
        tb = min(_round_up(B, 8), 256)
    else:
        tb = max(8, _round_up(min(int(tile_b), _round_up(B, 8)), 8))

    c_full = _round_up(C, 128)
    # VMEM bytes per 128 class columns:
    #   2x (double-buffered) weight tile rows + 2x f32 output tile rows
    #   + inv_w row + ~3 f32 (tb,128) compiler temporaries (raw/cosine/select).
    per_col128 = 128 * (2 * D * stream_bytes + 2 * tb * 4 + 4 + 3 * tb * 4)
    fixed = 2 * tb * D * stream_bytes + 4 * tb * 4 + 4 * tb   # x, inv_x, label
    max_cols = max((budget - fixed) // per_col128, 1)

    tc = int(min(max_cols * 128, 8192, c_full))
    if tile_c is not None:
        tc = min(tc, _round_up(max(int(tile_c), 128), 128))
    tc = max(tc, 128)
    return tb, tc, vmem_limit


def _weight_spec(tc, D, stream_bytes, n_class_tiles):
    """Weight BlockSpec; 3-deep pipelining only when tiles are tiny and there
    are enough grid steps to hide the short DMAs behind."""
    idx = lambda i, j: (j, 0)
    if tc * D * stream_bytes < 512 * 1024 and n_class_tiles > 4:
        try:
            return pl.BlockSpec((tc, D), idx, pipeline_mode=pl.Buffered(3))
        except Exception:
            pass
    return pl.BlockSpec((tc, D), idx)


# --------------------------------------------------------------------------- #
# Wrapper
# --------------------------------------------------------------------------- #
def arc_margin_product(x, weight, label, *, s=30.0, m=0.5, easy_margin=False,
                       stream_dtype=jnp.bfloat16, tile_c=None, tile_b=None):
    """x: (B, D), weight: (C, D), label: (B,) int. Returns (B, C) float32."""
    xf = jnp.asarray(x, jnp.float32)
    wf = jnp.asarray(weight, jnp.float32)
    B, D = xf.shape
    C, D2 = wf.shape
    assert D == D2

    sb = jnp.dtype(stream_dtype).itemsize
    tb, tc, vmem_limit = _pick_tiles(B, C, D, sb, tile_c, tile_b)

    b_pad = _round_up(B, tb)
    c_pad = _round_up(C, tc)

    # Zero-padded rows/columns: cosine comes out exactly 0 (0 * huge-rsqrt),
    # padded labels are -1 so they never match, and everything is sliced off.
    if b_pad != B:
        xf = jnp.pad(xf, ((0, b_pad - B), (0, 0)))
    if c_pad != C:
        wf = jnp.pad(wf, ((0, c_pad - C), (0, 0)))

    # Hoisted row norms (f32), folded into the matmul output inside the kernel.
    # rsqrt(max(||v||^2, 1e-24)) == 1 / max(||v||, 1e-12)  (F.normalize eps).
    inv_x = lax.rsqrt(jnp.maximum(jnp.sum(xf * xf, axis=-1, keepdims=True),
                                  1e-24))                        # (b_pad, 1)
    inv_w = lax.rsqrt(jnp.maximum(jnp.sum(wf * wf, axis=-1, keepdims=True),
                                  1e-24)).reshape(1, c_pad)      # (1, c_pad)

    x_s = xf.astype(stream_dtype)
    w_s = wf.astype(stream_dtype)

    lab = jnp.asarray(label, jnp.int32).reshape(B, 1)
    if b_pad != B:
        lab = jnp.pad(lab, ((0, b_pad - B), (0, 0)), constant_values=-1)

    kernel = _make_arcmargin_kernel(s, m, easy_margin)

    n_b_tiles = b_pad // tb
    n_c_tiles = c_pad // tc
    cost = pl.CostEstimate(
        flops=2 * b_pad * c_pad * D,
        transcendentals=b_pad * n_c_tiles,
        bytes_accessed=(c_pad * D * sb * n_b_tiles        # streamed weights
                        + b_pad * D * sb                  # features
                        + b_pad * c_pad * 4               # output
                        + b_pad * 8 + c_pad * 4))         # inv_x, label, inv_w

    out = pl.pallas_call(
        kernel,
        out_shape=jax.ShapeDtypeStruct((b_pad, c_pad), jnp.float32),
        grid=(n_b_tiles, n_c_tiles),
        in_specs=[
            pl.BlockSpec((tb, D), lambda i, j: (i, 0)),    # x tile (stream dtype)
            _weight_spec(tc, D, sb, n_c_tiles),            # W tiles (streamed)
            pl.BlockSpec((tb, 1), lambda i, j: (i, 0)),    # inv_x (f32, hoisted)
            pl.BlockSpec((1, tc), lambda i, j: (0, j)),    # inv_w (f32, hoisted)
            pl.BlockSpec((tb, 1), lambda i, j: (i, 0)),    # labels
        ],
        out_specs=pl.BlockSpec((tb, tc), lambda i, j: (i, j)),  # lane-dense tile
        compiler_params=pltpu.CompilerParams(
            dimension_semantics=("parallel", "parallel"),
            vmem_limit_bytes=vmem_limit),
        cost_estimate=cost,
    )(x_s, w_s, inv_x, inv_w, lab)

    if b_pad != B or c_pad != C:
        out = out[:B, :C]
    return out


# --------------------------------------------------------------------------- #
# Pure-JAX reference mirroring the PyTorch forward
# --------------------------------------------------------------------------- #
def _reference(x, weight, label, *, s=30.0, m=0.5, easy_margin=False):
    x_n = x / jnp.maximum(jnp.linalg.norm(x, axis=1, keepdims=True), 1e-12)
    w_n = weight / jnp.maximum(jnp.linalg.norm(weight, axis=1, keepdims=True),
                               1e-12)
    cosine = x_n @ w_n.T
    sine = jnp.sqrt(jnp.clip(1.0 - cosine ** 2, 0.0, 1.0))
    phi = cosine * math.cos(m) - sine * math.sin(m)
    if easy_margin:
        phi = jnp.where(cosine > 0, phi, cosine)
    else:
        phi = jnp.where(cosine > math.cos(math.pi - m), phi,
                        cosine - math.sin(math.pi - m) * m)
    one_hot = jax.nn.one_hot(label, cosine.shape[1], dtype=cosine.dtype)
    return jnp.where(one_hot > 0, phi, cosine) * s


if __name__ == "__main__":
    key = jax.random.PRNGKey(0)
    kx, kw, kl = jax.random.split(key, 3)

    batch = 8
    in_features = 64
    out_features = 300   # not a multiple of 128 -> exercises class padding

    x = jax.random.normal(kx, (batch, in_features), dtype=jnp.float32)

    # Deterministic xavier_uniform_-style init for weight (out_features, in_features)
    bound = math.sqrt(6.0 / (in_features + out_features))
    weight = jax.random.uniform(
        kw, (out_features, in_features), minval=-bound, maxval=bound,
        dtype=jnp.float32)

    label = jax.random.randint(kl, (batch,), 0, out_features, dtype=jnp.int32)

    ref = _reference(x, weight, label, s=30.0, m=0.5, easy_margin=False)
    ref_easy = _reference(x, weight, label, s=30.0, m=0.5, easy_margin=True)

    # 1) f32 streaming: tight-tolerance structural check.
    out_f32 = jax.block_until_ready(
        arc_margin_product(x, weight, label, s=30.0, m=0.5, easy_margin=False,
                           stream_dtype=jnp.float32))
    assert out_f32.shape == (batch, out_features)
    assert jnp.allclose(out_f32, ref, atol=1e-4, rtol=1e-4), \
        "mismatch vs reference (f32 stream)"

    # 2) bf16 streaming (default fast path; halves HBM weight traffic).
    out_bf16 = jax.block_until_ready(
        arc_margin_product(x, weight, label, s=30.0, m=0.5, easy_margin=False))
    assert jnp.allclose(out_bf16, ref, atol=5e-2, rtol=2e-2), \
        "mismatch vs reference (bf16 stream)"

    # 3) easy-margin branch.
    out_easy = jax.block_until_ready(
        arc_margin_product(x, weight, label, s=30.0, m=0.5, easy_margin=True))
    assert jnp.allclose(out_easy, ref_easy, atol=5e-2, rtol=2e-2), \
        "mismatch vs reference (easy_margin)"

    print("KERNEL_OK")
</pallas_src>

<mosaic_0001>
module attributes {stable_mosaic.version = 11 : i64} {
  func.func @kernel(%arg0: i32, %arg1: i32, %arg2: memref<8x64xf32, #tpu.memory_space<vmem>>, %arg3: memref<384x64xf32, #tpu.memory_space<vmem>>, %arg4: memref<8x1xf32, #tpu.memory_space<vmem>>, %arg5: memref<1x384xf32, #tpu.memory_space<vmem>>, %arg6: memref<8x1xi32, #tpu.memory_space<vmem>>, %arg7: memref<8x384xf32, #tpu.memory_space<vmem>>) attributes {dimension_semantics = [#tpu.dimension_semantics<parallel>, #tpu.dimension_semantics<parallel>], iteration_bounds = array<i64: 1, 1>, scalar_prefetch = 0 : i64, scratch_operands = 0 : i64, tpu.core_type = #tpu.core_type<tc>, window_params = [{transform_indices = @transform_0, window_bounds = array<i64: 8, 64>}, {transform_indices = @transform_1, window_bounds = array<i64: 384, 64>}, {transform_indices = @transform_2, window_bounds = array<i64: 8, 1>}, {transform_indices = @transform_3, window_bounds = array<i64: 1, 384>}, {transform_indices = @transform_4, window_bounds = array<i64: 8, 1>}, {transform_indices = @transform_5, window_bounds = array<i64: 8, 384>}]} {
    %c0 = arith.constant 0 : index
    %c0_0 = arith.constant 0 : index
    %0 = vector.load %arg2[%c0, %c0_0] : memref<8x64xf32, #tpu.memory_space<vmem>>, vector<8x64xf32>
    %c0_1 = arith.constant 0 : index
    %c0_2 = arith.constant 0 : index
    %1 = vector.load %arg3[%c0_1, %c0_2] : memref<384x64xf32, #tpu.memory_space<vmem>>, vector<384x64xf32>
    %cst = arith.constant dense<0.000000e+00> : vector<8x384xf32>
    %2 = tpu.matmul %0, %1, %cst {dimension_numbers = #tpu.dot_dimension_numbers<[1], [1], [0], [0], [0, 0, 1, 0], [], []>} : vector<8x64xf32>, vector<384x64xf32>, vector<8x384xf32> -> vector<8x384xf32>
    %c0_3 = arith.constant 0 : index
    %c0_4 = arith.constant 0 : index
    %3 = vector.load %arg4[%c0_3, %c0_4] : memref<8x1xf32, #tpu.memory_space<vmem>>, vector<8x1xf32>
    %4 = vector.broadcast %3 : vector<8x1xf32> to vector<8x384xf32>
    %5 = arith.mulf %2, %4 : vector<8x384xf32>
    %c0_5 = arith.constant 0 : index
    %c0_6 = arith.constant 0 : index
    %6 = vector.load %arg5[%c0_5, %c0_6] : memref<1x384xf32, #tpu.memory_space<vmem>>, vector<1x384xf32>
    %7 = vector.broadcast %6 : vector<1x384xf32> to vector<8x384xf32>
    %8 = arith.mulf %5, %7 : vector<8x384xf32>
    %c384_i32 = arith.constant 384 : i32
    %9 = arith.muli %arg1, %c384_i32 : i32
    %10 = tpu.iota {dimensions = array<i32: 1>} : vector<8x384xi32>
    %11 = vector.broadcast %9 : i32 to vector<8x384xi32>
    %12 = arith.addi %11, %10 : vector<8x384xi32>
    %c0_7 = arith.constant 0 : index
    %c0_8 = arith.constant 0 : index
    %13 = vector.load %arg6[%c0_7, %c0_8] : memref<8x1xi32, #tpu.memory_space<vmem>>, vector<8x1xi32>
    %14 = vector.broadcast %13 : vector<8x1xi32> to vector<8x384xi32>
    %15 = arith.cmpi eq, %12, %14 : vector<8x384xi32>
    %cst_9 = arith.constant 0.000000e+00 : f32
    %16 = vector.broadcast %cst_9 : f32 to vector<8x384xf32>
    %17 = arith.select %15, %8, %16 : vector<8x384xi1>, vector<8x384xf32>
    %cst_10 = arith.constant dense<0.000000e+00> : vector<8xf32>
    %18 = vector.multi_reduction <add>, %17, %cst_10 [1] : vector<8x384xf32> to vector<8xf32>
    %19 = vector.shape_cast %18 : vector<8xf32> to vector<8x1xf32>
    %20 = arith.mulf %19, %19 : vector<8x1xf32>
    %cst_11 = arith.constant 1.000000e+00 : f32
    %21 = vector.broadcast %cst_11 : f32 to vector<8x1xf32>
    %22 = arith.subf %21, %20 : vector<8x1xf32>
    %cst_12 = arith.constant 0.000000e+00 : f32
    %cst_13 = arith.constant 1.000000e+00 : f32
    %23 = vector.broadcast %cst_12 : f32 to vector<8x1xf32>
    %24 = arith.maximumf %23, %22 : vector<8x1xf32>
    %25 = vector.broadcast %cst_13 : f32 to vector<8x1xf32>
    %26 = arith.minimumf %25, %24 : vector<8x1xf32>
    %27 = math.sqrt %26 : vector<8x1xf32>
    %cst_14 = arith.constant 0.87758255 : f32
    %28 = vector.broadcast %cst_14 : f32 to vector<8x1xf32>
    %29 = arith.mulf %19, %28 : vector<8x1xf32>
    %cst_15 = arith.constant 0.47942555 : f32
    %30 = vector.broadcast %cst_15 : f32 to vector<8x1xf32>
    %31 = arith.mulf %27, %30 : vector<8x1xf32>
    %32 = arith.subf %29, %31 : vector<8x1xf32>
    %cst_16 = arith.constant -0.87758255 : f32
    %33 = vector.broadcast %cst_16 : f32 to vector<8x1xf32>
    %34 = arith.cmpf ogt, %19, %33 : vector<8x1xf32>
    %cst_17 = arith.constant 0.239712775 : f32
    %35 = vector.broadcast %cst_17 : f32 to vector<8x1xf32>
    %36 = arith.subf %19, %35 : vector<8x1xf32>
    %37 = arith.select %34, %32, %36 : vector<8x1xi1>, vector<8x1xf32>
    %38 = vector.shape_cast %37 : vector<8x1xf32> to vector<8x1xf32>
    %39 = vector.broadcast %38 : vector<8x1xf32> to vector<8x384xf32>
    %40 = arith.select %15, %39, %8 : vector<8x384xi1>, vector<8x384xf32>
    %cst_18 = arith.constant 3.000000e+01 : f32
    %41 = vector.broadcast %cst_18 : f32 to vector<8x384xf32>
    %42 = arith.mulf %40, %41 : vector<8x384xf32>
    %c0_19 = arith.constant 0 : index
    %c0_20 = arith.constant 0 : index
    %43 = vector.load %arg7[%c0_19, %c0_20] : memref<8x384xf32, #tpu.memory_space<vmem>>, vector<8x384xf32>
    tpu.vector_store %arg7[%c0_19, %c0_20], %42 {strides = array<i32>} : memref<8x384xf32, #tpu.memory_space<vmem>>, vector<8x384xf32>,
    return
  }
  func.func @transform_0(%arg0: i32, %arg1: i32) -> (i32, i32) {
    %c0_i32 = arith.constant 0 : i32
    %c0_i32_0 = arith.constant 0 : i32
    return %arg0, %c0_i32 : i32, i32
  }
  func.func @transform_1(%arg0: i32, %arg1: i32) -> (i32, i32) {
    %c0_i32 = arith.constant 0 : i32
    %c0_i32_0 = arith.constant 0 : i32
    return %arg1, %c0_i32 : i32, i32
  }
  func.func @transform_2(%arg0: i32, %arg1: i32) -> (i32, i32) {
    %c0_i32 = arith.constant 0 : i32
    %c0_i32_0 = arith.constant 0 : i32
    return %arg0, %c0_i32 : i32, i32
  }
  func.func @transform_3(%arg0: i32, %arg1: i32) -> (i32, i32) {
    %c0_i32 = arith.constant 0 : i32
    %c0_i32_0 = arith.constant 0 : i32
    return %c0_i32, %arg1 : i32, i32
  }
  func.func @transform_4(%arg0: i32, %arg1: i32) -> (i32, i32) {
    %c0_i32 = arith.constant 0 : i32
    %c0_i32_0 = arith.constant 0 : i32
    return %arg0, %c0_i32 : i32, i32
  }
  func.func @transform_5(%arg0: i32, %arg1: i32) -> (i32, i32) {
    %c0_i32 = arith.constant 0 : i32
    return %arg0, %arg1 : i32, i32
  }
}

</mosaic_0001>

<bundles_post_ra>
// kernel: tpu_custom_call.1
= control target key start
LH: loop header
LB: loop body
LE: loop exit
PB: predicated region body
PF: predicated region fallthrough
CT: control target
= control target key end

     0   :  { %vm70_vm0 = vcmask 523264   ;;  %s699_s0 = inlined_call_operand.vmem [shape: f32[8,64], index: 0, kind: input, shape index: {}]   ;;  %s700_s1 = inlined_call_operand.vmem [shape: f32[384,64], index: 1, kind: input, shape index: {}]   ;;  %s701_s2 = inlined_call_operand.vmem [shape: f32[8,1], index: 2, kind: input, shape index: {}]   ;;  %s702_s3 = inlined_call_operand.vmem [shape: f32[1,384], index: 3, kind: input, shape index: {}]   ;;  %s703_s4 = inlined_call_operand.vmem [shape: s32[8,1], index: 4, kind: input, shape index: {}]   ;;  %s704_s5 = inlined_call_operand.hbm [shape: f32[8,384], index: 5, kind: output, shape index: {}]  }
   0x1   :  { %v37_v0 = vld [vmem:[%s700_s1 + $0x78] sm:$0xff]  ;;  %v36_v3 = vld [vmem:[%s700_s1 + $0x70] sm:$0xff]  ;;  %v35_v6 = vld [vmem:[%s700_s1 + $0x68] sm:$0xff] }
   0x2   :  { %v53_v1 = vld [vmem:[%s700_s1 + $0xf8] sm:$0xff]  ;;  %368 = vmatpush.xpose.msk.msra.mxu0 %vm70_vm0, %v37_v0  ;;  %v52_v4 = vld [vmem:[%s700_s1 + $0xf0] sm:$0xff]  ;;  %v51_v7 = vld [vmem:[%s700_s1 + $0xe8] sm:$0xff] }
   0x3   :  { %v69_v2 = vld [vmem:[%s700_s1 + $0x178] sm:$0xff]  ;;  %385 = vmatpush.xpose.msk.msra.mxu1 %vm70_vm0, %v53_v1  ;;  %v68_v5 = vld [vmem:[%s700_s1 + $0x170] sm:$0xff]  ;;  %v67_v8 = vld [vmem:[%s700_s1 + $0x168] sm:$0xff] }
   0x4   :  { %402 = vmatpush.xpose.msk.msra.mxu2 %vm70_vm0, %v69_v2  ;;  %v34_v9 = vld [vmem:[%s700_s1 + $0x60] sm:$0xff] }
   0x5   :  { %v50_v10 = vld [vmem:[%s700_s1 + $0xe0] sm:$0xff] }
   0x6   :  { %369 = vmatpush.xpose.msk.msra.mxu0 %vm70_vm0, %v36_v3  ;;  %v66_v11 = vld [vmem:[%s700_s1 + $0x160] sm:$0xff] }
   0x7   :  { %386 = vmatpush.xpose.msk.msra.mxu1 %vm70_vm0, %v52_v4 }
   0x8   :  { %403 = vmatpush.xpose.msk.msra.mxu2 %vm70_vm0, %v68_v5 }
   0xa   :  { %370 = vmatpush.xpose.msk.msra.mxu0 %vm70_vm0, %v35_v6 }
   0xb   :  { %387 = vmatpush.xpose.msk.msra.mxu1 %vm70_vm0, %v51_v7 }
   0xc   :  { %404 = vmatpush.xpose.msk.msra.mxu2 %vm70_vm0, %v67_v8 }
   0xd   :  { %10 = vsyncpa [#allocation3], 0  ;;  %v33_v12 = vld [vmem:[%s700_s1 + $0x58] sm:$0xff]  ;;  %v32_v15 = vld [vmem:[%s700_s1 + $0x50] sm:$0xff]  ;;  %v451_v30 = vmov 0   ;;  %v299_v53 = vlaneseq  ;;  %s359_s19 = sshll.u32 %s704_s5, 4  ;;  %s360_s19 = int_to_ptr.hbm [resolvable:$true] %s359_s19 }
   0xe   :  { %371 = vmatpush.xpose.msk.msra.mxu0 %vm70_vm0, %v34_v9  ;;  %v49_v13 = vld [vmem:[%s700_s1 + $0xd8] sm:$0xff]  ;;  %v48_v16 = vld [vmem:[%s700_s1 + $0xd0] sm:$0xff]  ;;  %v31_v18 = vld [vmem:[%s700_s1 + $0x48] sm:$0xff]  ;;  %422 = vset.pattern.permute.xlu0 %v451_v30 }
   0xf   :  { %388 = vmatpush.xpose.msk.msra.mxu1 %vm70_vm0, %v50_v10  ;;  %v65_v14 = vld [vmem:[%s700_s1 + $0x158] sm:$0xff]  ;;  %v64_v17 = vld [vmem:[%s700_s1 + $0x150] sm:$0xff]  ;;  %v47_v19 = vld [vmem:[%s700_s1 + $0xc8] sm:$0xff]  ;;  %v300_v55 = vand.u32 127, %v299_v53 }
  0x10   :  { %405 = vmatpush.xpose.msk.msra.mxu2 %vm70_vm0, %v66_v11  ;;  %v63_v20 = vld [vmem:[%s700_s1 + $0x148] sm:$0xff]  ;;  %v30_v21 = vld [vmem:[%s700_s1 + $0x40] sm:$0xff]  ;;  %v29_v24 = vld [vmem:[%s700_s1 + $0x38] sm:$0xff] }
  0x11   :  { %v46_v22 = vld [vmem:[%s700_s1 + $0xc0] sm:$0xff]  ;;  %v45_v25 = vld [vmem:[%s700_s1 + $0xb8] sm:$0xff]  ;;  %v28_v28 = vld [vmem:[%s700_s1 + $0x30] sm:$0xff]  ;;  %v301_v62 = vadd.s32 128, %v300_v55  ;;  %v302_v3 = vadd.s32 256, %v300_v55 }
  0x12   :  { %372 = vmatpush.xpose.msk.msra.mxu0 %vm70_vm0, %v33_v12  ;;  %v62_v23 = vld [vmem:[%s700_s1 + $0x140] sm:$0xff]  ;;  %v61_v26 = vld [vmem:[%s700_s1 + $0x138] sm:$0xff]  ;;  %v44_v29 = vld [vmem:[%s700_s1 + $0xb0] sm:$0xff] }
  0x13   :  { %389 = vmatpush.xpose.msk.msra.mxu1 %vm70_vm0, %v49_v13  ;;  %v278_v27 = vld [vmem:[%s701_s2] sm:$0xff]  ;;  %v60_v31 = vld [vmem:[%s700_s1 + $0x130] sm:$0xff]  ;;  %v27_v32 = vld [vmem:[%s700_s1 + $0x28] sm:$0xff] }
  0x14   :  { %406 = vmatpush.xpose.msk.msra.mxu2 %vm70_vm0, %v65_v14  ;;  %281 = vperm.xlu0 %422, %v278_v27   ;;  %v43_v33 = vld [vmem:[%s700_s1 + $0xa8] sm:$0xff]  ;;  %v307_v35 = vld [vmem:[%s703_s4] sm:$0xff]  ;;  %v25_v39 = vld [vmem:[%s700_s1 + $0x18] sm:$0xff] }
  0x15   :  { %v59_v34 = vld [vmem:[%s700_s1 + $0x128] sm:$0xff]  ;;  %v26_v36 = vld [vmem:[%s700_s1 + $0x20] sm:$0xff]  ;;  %v41_v40 = vld [vmem:[%s700_s1 + $0x98] sm:$0xff] }
  0x16   :  { %373 = vmatpush.xpose.msk.msra.mxu0 %vm70_vm0, %v32_v15  ;;  %v42_v37 = vld [vmem:[%s700_s1 + $0xa0] sm:$0xff]  ;;  %v57_v41 = vld [vmem:[%s700_s1 + $0x118] sm:$0xff]  ;;  %v24_v42 = vld [vmem:[%s700_s1 + $0x10] sm:$0xff] }
  0x17   :  { %390 = vmatpush.xpose.msk.msra.mxu1 %vm70_vm0, %v48_v16  ;;  %v58_v38 = vld [vmem:[%s700_s1 + $0x120] sm:$0xff]  ;;  %v40_v43 = vld [vmem:[%s700_s1 + $0x90] sm:$0xff]  ;;  %v23_v45 = vld [vmem:[%s700_s1 + $0x8] sm:$0xff] }
  0x18   :  { %407 = vmatpush.xpose.msk.msra.mxu2 %vm70_vm0, %v64_v17  ;;  %v56_v44 = vld [vmem:[%s700_s1 + $0x110] sm:$0xff]  ;;  %v39_v46 = vld [vmem:[%s700_s1 + $0x88] sm:$0xff]  ;;  %v22_v48 = vld [vmem:[%s700_s1] sm:$0xff] }
  0x19   :  { %v55_v47 = vld [vmem:[%s700_s1 + $0x108] sm:$0xff]  ;;  %v38_v49 = vld [vmem:[%s700_s1 + $0x80] sm:$0xff] }
  0x1a   :  { %374 = vmatpush.xpose.msk.msra.mxu0 %vm70_vm0, %v31_v18  ;;  %v54_v50 = vld [vmem:[%s700_s1 + $0x100] sm:$0xff] }
  0x1b   :  { %391 = vmatpush.xpose.msk.msra.mxu1 %vm70_vm0, %v47_v19  ;;  %v21_v51 = vld [vmem:[%s699_s0] sm:$0xff]  ;;  %s452_s0 = smov [#allocation2]  }
  0x1c   :  { %408 = vmatpush.xpose.msk.msra.mxu2 %vm70_vm0, %v63_v20  ;;  %309 = vperm.xlu0 %422, %v307_v35   ;;  %v287_v54 = vld [vmem:[%s702_s3] sm:$0x7]  ;;  %s357_s3 = sshll.u32 %s452_s0, 4  ;;  %s358_s3 = int_to_ptr.vmem [resolvable:$true] %s357_s3 }
  0x1d   :  { %v289_v57 = vperm.slane %v287_v54, 0  ;;  %v290_v59 = vperm.slane %v287_v54, 1  ;;  %v291_v2 = vperm.slane %v287_v54, 2 }
  0x1e   :  { %375 = vmatpush.xpose.msk.msra.mxu0 %vm70_vm0, %v30_v21 }
  0x1f   :  { %392 = vmatpush.xpose.msk.msra.mxu1 %vm70_vm0, %v46_v22 }
  0x20   :  { %409 = vmatpush.xpose.msk.msra.mxu2 %vm70_vm0, %v62_v23 }
  0x22   :  { %376 = vmatpush.xpose.msk.msra.mxu0 %vm70_vm0, %v29_v24 }
  0x23   :  { %393 = vmatpush.xpose.msk.msra.mxu1 %vm70_vm0, %v45_v25 }
  0x24   :  { %410 = vmatpush.xpose.msk.msra.mxu2 %vm70_vm0, %v61_v26 }
  0x26   :  { %377 = vmatpush.xpose.msk.msra.mxu0 %vm70_vm0, %v28_v28 }
  0x27   :  { %394 = vmatpush.xpose.msk.msra.mxu1 %vm70_vm0, %v44_v29 }
  0x28   :  { %411 = vmatpush.xpose.msk.msra.mxu2 %vm70_vm0, %v60_v31 }
  0x2a   :  { %378 = vmatpush.xpose.msk.msra.mxu0 %vm70_vm0, %v27_v32 }
  0x2b   :  { %395 = vmatpush.xpose.msk.msra.mxu1 %vm70_vm0, %v43_v33 }
  0x2c   :  { %412 = vmatpush.xpose.msk.msra.mxu2 %vm70_vm0, %v59_v34 }
  0x2e   :  { %379 = vmatpush.xpose.msk.msra.mxu0 %vm70_vm0, %v26_v36 }
  0x2f   :  { %396 = vmatpush.xpose.msk.msra.mxu1 %vm70_vm0, %v42_v37 }
  0x30   :  { %413 = vmatpush.xpose.msk.msra.mxu2 %vm70_vm0, %v58_v38 }
  0x32   :  { %380 = vmatpush.xpose.msk.msra.mxu0 %vm70_vm0, %v25_v39 }
  0x33   :  { %397 = vmatpush.xpose.msk.msra.mxu1 %vm70_vm0, %v41_v40 }
  0x34   :  { %414 = vmatpush.xpose.msk.msra.mxu2 %vm70_vm0, %v57_v41 }
  0x36   :  { %381 = vmatpush.xpose.msk.msra.mxu0 %vm70_vm0, %v24_v42 }
  0x37   :  { %398 = vmatpush.xpose.msk.msra.mxu1 %vm70_vm0, %v40_v43 }
  0x38   :  { %415 = vmatpush.xpose.msk.msra.mxu2 %vm70_vm0, %v56_v44 }
  0x3a   :  { %382 = vmatpush.xpose.msk.msra.mxu0 %vm70_vm0, %v23_v45 }
  0x3b   :  { %399 = vmatpush.xpose.msk.msra.mxu1 %vm70_vm0, %v39_v46 }
  0x3c   :  { %416 = vmatpush.xpose.msk.msra.mxu2 %vm70_vm0, %v55_v47 }
  0x3e   :  { %383 = vmatpush.xpose.msk.msra.mxu0 %vm70_vm0, %v22_v48 }
  0x3f   :  { %400 = vmatpush.xpose.msk.msra.mxu1 %vm70_vm0, %v38_v49 }
  0x40   :  { %417 = vmatpush.xpose.msk.msra.mxu2 %vm70_vm0, %v54_v50 }
  0x41   :  { %384 = vmatmul.msk.f32.vlgmr.msra.gmra.mxu0 %vm70_vm0, %v21_v51 }
  0x42   :  { %401 = vmatmul.msk.f32.vlgmr.msra.gmra.mxu1 %vm70_vm0, %v21_v51 }
  0x43   :  { %418 = vmatmul.msk.f32.vlgmr.msra.gmra.mxu2 %vm70_vm0, %v21_v51 }
  0x86   :  { %v282_v52 = vpop.permute.xlu0 %281 }
  0x8e   :  { %v310_v63 = vpop.permute.xlu0 %309 }
  0x8f   :  { %vm311_vm1 = vcmp.eq.s32.totalorder %v300_v55, %v310_v63  ;;  %vm312_vm2 = vcmp.eq.s32.totalorder %v301_v62, %v310_v63  ;;  %vm313_vm3 = vcmp.eq.s32.totalorder %v302_v3, %v310_v63 }
  0xbe   :  { %v235_v56 = vpop.f32.mrf.mxu0 }
  0xbf   :  { %v255_v58 = vpop.f32.mrf.mxu1  ;;  %v284_v60 = vmul.f32 %v282_v52, %v235_v56 }
  0xc0   :  { %v285_v61 = vmul.f32 %v282_v52, %v255_v58 }
  0xc1   :  { %v295_v0 = vmul.f32 %v289_v57, %v284_v60 }
  0xc2   :  { %v296_v1 = vmul.f32 %v290_v59, %v285_v61 }
  0xc3   :  { %v314_v6 = vsel %vm311_vm1, %v295_v0, 0.0 }
  0xc4   :  { %v315_v7 = vsel %vm312_vm2, %v296_v1, 0.0 }
  0xc5   :  { %v317_v9 = vadd.f32 %v315_v7, %v314_v6 }
  0xc6   :  { %v275_v4 = vpop.f32.mrf.mxu2 }
  0xc7   :  { %v286_v5 = vmul.f32 %v282_v52, %v275_v4 }
  0xc9   :  { %v297_v8 = vmul.f32 %v291_v2, %v286_v5 }
  0xcb   :  { %v316_v10 = vsel %vm313_vm3, %v297_v8, 0.0 }
  0xcc   :  { %v318_v11 = vadd.f32 %v317_v9, %v316_v10 }
  0xce   :  { %319 = vadd.xlane.f32.xlu1 %v318_v11 }
 0x141   :  { %v320_v12 = vpop.xlane.xlu1 %319 }
 0x142   :  { %v321_v13 = vmul.f32 %v320_v12, %v320_v12  ;;  %v337_v27 = vmul.f32 0.87758255, %v320_v12  ;;  %v419_v30 = vadd.f32 -0.23971277, %v320_v12  ;;  %vm340_vm6 = vcmp.gt.f32.partialorder %v320_v12, -0.87758255 }
 0x144   :  { %v322_v14 = vsub.f32 1.0, %v321_v13 }
 0x146   :  { %v323_v15 = vmax.f32 %v322_v14, 0.0 }
 0x148   :  { %v324_v16 = vmin.f32 %v323_v15, 1.0 }
 0x14a   :  { %423 = vrsqrt.f32 %v324_v16  ;;  %vm332_vm4 = vcmp.eq.f32.partialorder %v324_v16, inf  ;;  %v335_v24 = vand.u32 2147483648, %v324_v16  ;;  %vm334_vm5 = vcmp.eq.f32.partialorder %v324_v16, 0.0 }
 0x150   :  { %v424_v17 = vpop.eup %423 }
 0x151   :  { %v326_v18 = vmul.f32 %v424_v17, %v324_v16 }
 0x153   :  { %v327_v19 = vmul.f32 %v424_v17, %v326_v18 }
 0x155   :  { %v328_v20 = vmul.f32 0.5, %v327_v19 }
 0x157   :  { %v329_v21 = vsub.f32 1.5, %v328_v20 }
 0x159   :  { %v330_v22 = vmul.f32 %v424_v17, %v329_v21 }
 0x15b   :  { %v331_v23 = vmul.f32 %v330_v22, %v324_v16 }
 0x15d   :  { %v333_v25 = vsel %vm332_vm4, %v324_v16, %v331_v23 }
 0x15e   :  { %v336_v26 = vsel %vm334_vm5, %v335_v24, %v333_v25 }
 0x15f   :  { %v338_v28 = vmul.f32 0.47942555, %v336_v26 }
 0x161   :  { %v339_v29 = vsub.f32 %v337_v27, %v338_v28 }
 0x163   :  { %v342_v31 = vsel %vm340_vm6, %v339_v29, %v419_v30 }
 0x164   :  { %v343_v32 = vsel %vm311_vm1, %v342_v31, %v295_v0  ;;  %v344_v33 = vsel %vm312_vm2, %v342_v31, %v296_v1  ;;  %v345_v34 = vsel %vm313_vm3, %v342_v31, %v297_v8 }
 0x165   :  { %v346_v35 = vmul.f32 30.0, %v343_v32  ;;  %v347_v36 = vmul.f32 30.0, %v344_v33  ;;  %v348_v37 = vmul.f32 30.0, %v345_v34 }
 0x167   :  { %349 = vst [vmem:[#allocation2] sm:$0xff] %v346_v35 }
 0x168   :  { %350 = vst [vmem:[#allocation2 + $0x8] sm:$0xff] %v347_v36 }
 0x169   :  { %351 = vst [vmem:[#allocation2 + $0x10] sm:$0xff] %v348_v37 }
 0x16a   :  { %362 = dma.vmem_to_hbm [thread:$0]  %s358_s3, 384, %s360_s19, [#allocation3]  }
 0x16b   :  { %449 = dma.done.wait [#allocation3], 384  }
 0x16c   :  { %450 = vsyncadd [#allocation3], 4294966912 }
 0x16d   :  { %367 = vsyncpa [#allocation3], 1 }

</bundles_post_ra>
